<compile_context>
chip_gen: v7x
topology: tpu7x:2x2x1
jax: 0.10.0
libtpu: 0.0.40
codegen_flags: <defaults>
</compile_context>

<pallas_src>
import jax
import jax.numpy as jnp
from jax import lax
from jax.experimental import pallas as pl
from jax.experimental.pallas import tpu as pltpu


def _round_up(v, m):
    return ((v + m - 1) // m) * m


def build_dilations(layers, stacks):
    return tuple(2 ** l for _ in range(stacks) for l in range(layers))


# ----------------------------------------------------------------------------
# Fused kernel: the whole residual stack, `bf` batch segments per grid step.
# ----------------------------------------------------------------------------
def _make_stack_kernel(dilations, skip_size, cp, sp, tpad, skpad, t, bf, w,
                       compute_dtype):
    f32 = jnp.float32
    L = len(dilations)
    MASK_EVERY = 8  # re-zero padding columns every few layers (bounds junk growth)
    mask_layers = {i for i in range(L) if (i + 1) % MASK_EVERY == 0 and (i + 1) < L}

    def kernel(x_ref, w01_ref, wrs_ref, bdc_ref, brs_ref, skip_ref):
        # Running residual lives entirely on-chip (f32) for the whole stack.
        cur = x_ref[0].astype(f32)                              # (cp, w)
        if mask_layers:
            col = lax.broadcasted_iota(jnp.int32, (cp, w), 1) % tpad

        t_valid = t
        for l, d in enumerate(dilations):                       # static unroll (small L)
            t_out = t_valid - d

            # Dilated causal conv, both taps in ONE MXU push (K = 2*cp):
            #   y[:, j] = w0 @ cur[:, j] + w1 @ cur[:, j+d]
            # The wrap of the roll only lands in padding columns (>= t_out).
            cur_sh = pltpu.roll(cur, shift=w - d, axis=1)       # cur_sh[:, j] = cur[:, j+d]
            rhs = jnp.concatenate([cur, cur_sh], axis=0).astype(compute_dtype)
            y = jnp.dot(w01_ref[l], rhs, preferred_element_type=f32) + bdc_ref[l]
            gates = jnp.maximum(y, 0.0)                         # valid: local col < t_out

            # Residual + skip 1x1 convs fused into one matmul (M = cp+sp) over the
            # full tile; the extra skip columns ride in otherwise-padded MXU rows.
            rs = (jnp.dot(wrs_ref[l], gates.astype(compute_dtype),
                          preferred_element_type=f32) + brs_ref[l])

            # Lane-dense skip store: rotate each batch segment's window
            # [t_out-skip_size, t_out) to the segment start, then store aligned
            # (sp, skpad) slabs (skpad is a multiple of 128 -> unmasked vst).
            sk = rs[cp:, :]                                     # (sp, w)
            sh = (w - (t_out - skip_size)) % w
            if sh:
                sk = pltpu.roll(sk, shift=sh, axis=1)
            for bi in range(bf):
                skip_ref[l, bi] = sk[:, bi * tpad:bi * tpad + skpad].astype(
                    skip_ref.dtype)

            # Residual carry: res[:, j] = conv(gates)[:, j] + cur[:, j+d].
            cur = rs[:cp, :] + cur_sh
            if l in mask_layers:                                # periodic padding re-zero
                cur = jnp.where(col < t_out, cur, 0.0)
            t_valid = t_out

    return kernel


# ----------------------------------------------------------------------------
# Wrapper: pack/pad operands, derive VMEM budget, run the single fused call.
# ----------------------------------------------------------------------------
def residual_stack_forward(x, params, dilations, skip_size,
                           compute_dtype=jnp.bfloat16, batch_per_step=None):
    f32 = jnp.float32
    B, C, T = x.shape
    L = len(dilations)
    S = params["w_skip"].shape[1]

    # Each layer must keep at least skip_size valid timesteps.
    t_v = T
    for d in dilations:
        t_v -= d
        if t_v < skip_size:
            raise ValueError("skip_size too large for the given dilations / T")

    Cp = max(8, _round_up(C, 8))
    Sp = max(8, _round_up(S, 8))
    Tpad = max(128, _round_up(T, 128))
    SKpad = max(128, _round_up(skip_size, 128))        # <= Tpad since skip_size <= T
    cd = compute_dtype

    # Fold batches into the lane (time) axis: target >=256 lanes per matmul so the
    # 256-wide v6e/v7x MXU is full. (On v7x with B>=2 pass batch_per_step=1 to keep
    # >=2 parallel grid steps for the two TensorCores.)
    if batch_per_step is None:
        batch_per_step = max(1, -(-256 // Tpad))
    BF = max(1, min(B, batch_per_step))
    NB = -(-B // BF)
    Bpad = NB * BF
    W = BF * Tpad

    # ---- layout plumbing (zero padding keeps the math exact) -------------------
    x_p = jnp.zeros((Bpad, Cp, Tpad), cd).at[:B, :C, :T].set(x.astype(cd))
    x_p = x_p.reshape(NB, BF, Cp, Tpad).transpose(0, 2, 1, 3).reshape(NB, Cp, W)

    w_dc, w_res, w_skip = params["w_dc"], params["w_res"], params["w_skip"]
    # Fused dilated-conv weight: y = W01 @ [cur ; shift(cur, d)]  (K = 2*Cp).
    w01 = jnp.zeros((L, Cp, 2 * Cp), cd)
    w01 = w01.at[:, :C, :C].set(w_dc[..., 0].astype(cd))
    w01 = w01.at[:, :C, Cp:Cp + C].set(w_dc[..., 1].astype(cd))
    # Fused residual+skip weight: [res ; skip] = Wrs @ gates  (M = Cp+Sp).
    wrs = jnp.zeros((L, Cp + Sp, Cp), cd)
    wrs = wrs.at[:, :C, :C].set(w_res.astype(cd))
    wrs = wrs.at[:, Cp:Cp + S, :C].set(w_skip.astype(cd))
    # Biases stay f32 (added after the f32-accumulated matmuls).
    b_dc = jnp.zeros((L, Cp, 1), f32).at[:, :C, 0].set(params["b_dc"].astype(f32))
    b_rs = jnp.zeros((L, Cp + Sp, 1), f32)
    b_rs = b_rs.at[:, :C, 0].set(params["b_res"].astype(f32))
    b_rs = b_rs.at[:, Cp:Cp + S, 0].set(params["b_skip"].astype(f32))

    kernel = _make_stack_kernel(tuple(dilations), skip_size, Cp, Sp, Tpad, SKpad,
                                T, BF, W, cd)

    # VMEM budget: double-buffered operands + output block + live f32 temporaries,
    # clamped to the v7x 64 MiB physical ceiling.
    itb = jnp.dtype(cd).itemsize
    est = (2 * Cp * W * itb
           + 2 * (L * Cp * 2 * Cp + L * (Cp + Sp) * Cp) * itb
           + 2 * (L * Cp + L * (Cp + Sp)) * 4
           + 2 * L * BF * Sp * SKpad * 4
           + 10 * Cp * W * 4)
    vmem_limit = int(min(64 * 1024 * 1024, max(32 * 1024 * 1024, int(est * 1.25))))

    skips = pl.pallas_call(
        kernel,
        out_shape=jax.ShapeDtypeStruct((L, Bpad, Sp, SKpad), f32),
        grid=(NB,),
        in_specs=[
            pl.BlockSpec((1, Cp, W), lambda g: (g, 0, 0)),           # folded batch tile
            pl.BlockSpec((L, Cp, 2 * Cp), lambda g: (0, 0, 0)),      # fused dc weights
            pl.BlockSpec((L, Cp + Sp, Cp), lambda g: (0, 0, 0)),     # fused res+skip w
            pl.BlockSpec((L, Cp, 1), lambda g: (0, 0, 0)),           # dc bias
            pl.BlockSpec((L, Cp + Sp, 1), lambda g: (0, 0, 0)),      # res+skip bias
        ],
        out_specs=pl.BlockSpec((L, BF, Sp, SKpad), lambda g: (0, g, 0, 0)),
        compiler_params=pltpu.CompilerParams(
            dimension_semantics=("parallel",),
            vmem_limit_bytes=vmem_limit,
        ),
    )(x_p, w01, wrs, b_dc, b_rs)

    return skips[:, :B, :S, :skip_size].astype(x.dtype)


_fused_forward = jax.jit(
    residual_stack_forward,
    static_argnames=("dilations", "skip_size", "compute_dtype", "batch_per_step"))


# ----------------------------------------------------------------------------
# Deterministic synthetic parameters (shapes follow the PyTorch module).
# ----------------------------------------------------------------------------
def init_params(key, num_blocks, res_channels, skip_channels, dtype=jnp.float32):
    L, C, S = num_blocks, res_channels, skip_channels
    ks = jax.random.split(key, 6)
    return {
        "w_dc":   jax.random.normal(ks[0], (L, C, C, 2), dtype) * 0.3,  # dilated conv k=2
        "w_res":  jax.random.normal(ks[1], (L, C, C), dtype) * 0.3,     # 1x1 residual conv
        "w_skip": jax.random.normal(ks[2], (L, S, C), dtype) * 0.3,     # 1x1 skip conv
        "b_dc":   jax.random.normal(ks[3], (L, C), dtype) * 0.1,
        "b_res":  jax.random.normal(ks[4], (L, C), dtype) * 0.1,
        "b_skip": jax.random.normal(ks[5], (L, S), dtype) * 0.1,
    }


# ----------------------------------------------------------------------------
# Pure-JAX reference mirroring the PyTorch forward (and the compute-dtype casts).
# ----------------------------------------------------------------------------
def ref_forward(x, params, dilations, skip_size, compute_dtype=jnp.float32):
    cd, f32 = compute_dtype, jnp.float32
    cur = x.astype(cd).astype(f32)
    skips = []
    for l, d in enumerate(dilations):
        w0 = params["w_dc"][l, :, :, 0].astype(cd)
        w1 = params["w_dc"][l, :, :, 1].astype(cd)
        wr = params["w_res"][l].astype(cd)
        ws = params["w_skip"][l].astype(cd)
        b_dc = params["b_dc"][l][None, :, None].astype(f32)
        b_res = params["b_res"][l][None, :, None].astype(f32)
        b_sk = params["b_skip"][l][None, :, None].astype(f32)
        t_out = cur.shape[-1] - d
        xa = cur[:, :, :t_out]
        xb = cur[:, :, d:]
        y = (jnp.einsum("oc,bct->bot", w0, xa.astype(cd), preferred_element_type=f32)
             + jnp.einsum("oc,bct->bot", w1, xb.astype(cd), preferred_element_type=f32)
             + b_dc)
        gates = jnp.maximum(y, 0.0)
        res = (jnp.einsum("oc,bct->bot", wr, gates.astype(cd), preferred_element_type=f32)
               + b_res + xb)
        g_win = gates[:, :, t_out - skip_size:].astype(cd)
        skip = jnp.einsum("oc,bct->bot", ws, g_win, preferred_element_type=f32) + b_sk
        skips.append(skip)
        cur = res
    return jnp.stack(skips)


# ----------------------------------------------------------------------------
if __name__ == "__main__":
    layers, stacks = 2, 2                       # dilations: (1, 2, 1, 2)
    in_channels = res_channels = 4              # x must carry res_channels for block 0
    skip_channels = 6
    B, T = 2, 16
    skip_size = 8                               # <= shortest intermediate length (10)

    dilations = build_dilations(layers, stacks)
    key = jax.random.PRNGKey(0)
    kx, kp = jax.random.split(key)
    x = jax.random.normal(kx, (B, in_channels, T), jnp.float32)
    params = init_params(kp, len(dilations), res_channels, skip_channels)

    # bf16 MXU path (recommended for v6e/v7x) -- checked against a reference
    # that applies the same bf16 casts with f32 accumulation.
    out_bf16 = _fused_forward(x, params, dilations=dilations, skip_size=skip_size,
                              compute_dtype=jnp.bfloat16)
    out_bf16 = jax.block_until_ready(out_bf16)
    ref_bf16 = ref_forward(x, params, dilations, skip_size, compute_dtype=jnp.bfloat16)
    assert out_bf16.shape == (len(dilations), B, skip_channels, skip_size), out_bf16.shape
    err_bf16 = float(jnp.max(jnp.abs(out_bf16 - ref_bf16)))
    assert err_bf16 < 3e-2, err_bf16

    # f32 path (exact module semantics); tolerance covers TPU matmul precision modes.
    out_f32 = _fused_forward(x, params, dilations=dilations, skip_size=skip_size,
                             compute_dtype=jnp.float32)
    out_f32 = jax.block_until_ready(out_f32)
    ref_f32 = ref_forward(x, params, dilations, skip_size, compute_dtype=jnp.float32)
    err_f32 = float(jnp.max(jnp.abs(out_f32 - ref_f32)))
    assert err_f32 < 5e-2, err_f32

    print("KERNEL_OK")
</pallas_src>

<mosaic_0001>
module attributes {stable_mosaic.version = 11 : i64} {
  func.func @kernel(%arg0: i32, %arg1: memref<1x8x256xbf16, #tpu.memory_space<vmem>>, %arg2: memref<4x8x16xbf16, #tpu.memory_space<vmem>>, %arg3: memref<4x16x8xbf16, #tpu.memory_space<vmem>>, %arg4: memref<4x8x1xf32, #tpu.memory_space<vmem>>, %arg5: memref<4x16x1xf32, #tpu.memory_space<vmem>>, %arg6: memref<4x2x8x128xf32, #tpu.memory_space<vmem>>) attributes {dimension_semantics = [#tpu.dimension_semantics<parallel>], iteration_bounds = array<i64: 1>, scalar_prefetch = 0 : i64, scratch_operands = 0 : i64, tpu.core_type = #tpu.core_type<tc>, window_params = [{transform_indices = @transform_0, window_bounds = array<i64: 1, 8, 256>}, {pipeline_mode = #tpu.pipeline_mode<synchronous>, transform_indices = @transform_1, window_bounds = array<i64: 4, 8, 16>}, {pipeline_mode = #tpu.pipeline_mode<synchronous>, transform_indices = @transform_2, window_bounds = array<i64: 4, 16, 8>}, {pipeline_mode = #tpu.pipeline_mode<synchronous>, transform_indices = @transform_3, window_bounds = array<i64: 4, 8, 1>}, {pipeline_mode = #tpu.pipeline_mode<synchronous>, transform_indices = @transform_4, window_bounds = array<i64: 4, 16, 1>}, {transform_indices = @transform_5, window_bounds = array<i64: 4, 2, 8, 128>}]} {
    %c0 = arith.constant 0 : index
    %c0_0 = arith.constant 0 : index
    %c0_1 = arith.constant 0 : index
    %0 = vector.load %arg1[%c0, %c0_0, %c0_1] : memref<1x8x256xbf16, #tpu.memory_space<vmem>>, vector<1x8x256xbf16>
    %1 = vector.shape_cast %0 : vector<1x8x256xbf16> to vector<8x256xbf16>
    %2 = arith.extf %1 : vector<8x256xbf16> to vector<8x256xf32>
    %c255_i32 = arith.constant 255 : i32
    %3 = tpu.dynamic_rotate %2 by %c255_i32 dim 1 : vector<8x256xf32>, i32 -> vector<8x256xf32>
    %4 = tpu.concatenate %2, %3 in 0 : vector<8x256xf32>, vector<8x256xf32> -> vector<16x256xf32>
    %5 = arith.truncf %4 : vector<16x256xf32> to vector<16x256xbf16>
    %c0_2 = arith.constant 0 : index
    %c0_3 = arith.constant 0 : index
    %c0_4 = arith.constant 0 : index
    %6 = vector.load %arg2[%c0_2, %c0_3, %c0_4] : memref<4x8x16xbf16, #tpu.memory_space<vmem>>, vector<1x8x16xbf16>
    %7 = vector.shape_cast %6 : vector<1x8x16xbf16> to vector<8x16xbf16>
    %cst = arith.constant dense<0.000000e+00> : vector<8x256xf32>
    %8 = tpu.matmul %7, %5, %cst {dimension_numbers = #tpu.dot_dimension_numbers<[1], [0], [0], [1], [0, 0, 1, 1], [], []>} : vector<8x16xbf16>, vector<16x256xbf16>, vector<8x256xf32> -> vector<8x256xf32>
    %c0_5 = arith.constant 0 : index
    %c0_6 = arith.constant 0 : index
    %c0_7 = arith.constant 0 : index
    %9 = vector.load %arg4[%c0_5, %c0_6, %c0_7] : memref<4x8x1xf32, #tpu.memory_space<vmem>>, vector<1x8x1xf32>
    %10 = vector.shape_cast %9 : vector<1x8x1xf32> to vector<8x1xf32>
    %11 = vector.broadcast %10 : vector<8x1xf32> to vector<8x256xf32>
    %12 = arith.addf %8, %11 : vector<8x256xf32>
    %cst_8 = arith.constant 0.000000e+00 : f32
    %13 = vector.broadcast %cst_8 : f32 to vector<8x256xf32>
    %14 = arith.maximumf %12, %13 : vector<8x256xf32>
    %c0_9 = arith.constant 0 : index
    %c0_10 = arith.constant 0 : index
    %c0_11 = arith.constant 0 : index
    %15 = vector.load %arg3[%c0_9, %c0_10, %c0_11] : memref<4x16x8xbf16, #tpu.memory_space<vmem>>, vector<1x16x8xbf16>
    %16 = vector.shape_cast %15 : vector<1x16x8xbf16> to vector<16x8xbf16>
    %17 = arith.truncf %14 : vector<8x256xf32> to vector<8x256xbf16>
    %cst_12 = arith.constant dense<0.000000e+00> : vector<16x256xf32>
    %18 = tpu.matmul %16, %17, %cst_12 {dimension_numbers = #tpu.dot_dimension_numbers<[1], [0], [0], [1], [0, 0, 1, 1], [], []>} : vector<16x8xbf16>, vector<8x256xbf16>, vector<16x256xf32> -> vector<16x256xf32>
    %c0_13 = arith.constant 0 : index
    %c0_14 = arith.constant 0 : index
    %c0_15 = arith.constant 0 : index
    %19 = vector.load %arg5[%c0_13, %c0_14, %c0_15] : memref<4x16x1xf32, #tpu.memory_space<vmem>>, vector<1x16x1xf32>
    %20 = vector.shape_cast %19 : vector<1x16x1xf32> to vector<16x1xf32>
    %21 = vector.broadcast %20 : vector<16x1xf32> to vector<16x256xf32>
    %22 = arith.addf %18, %21 : vector<16x256xf32>
    %23 = vector.extract_strided_slice %22 {offsets = [8, 0], sizes = [8, 256], strides = [1, 1]} : vector<16x256xf32> to vector<8x256xf32>
    %c249_i32 = arith.constant 249 : i32
    %24 = tpu.dynamic_rotate %23 by %c249_i32 dim 1 : vector<8x256xf32>, i32 -> vector<8x256xf32>
    %25 = vector.extract_strided_slice %24 {offsets = [0, 0], sizes = [8, 128], strides = [1, 1]} : vector<8x256xf32> to vector<8x128xf32>
    %c0_16 = arith.constant 0 : index
    %c0_17 = arith.constant 0 : index
    %c0_18 = arith.constant 0 : index
    %c0_19 = arith.constant 0 : index
    %26 = vector.load %arg6[%c0_16, %c0_17, %c0_18, %c0_19] : memref<4x2x8x128xf32, #tpu.memory_space<vmem>>, vector<1x1x8x128xf32>
    %27 = vector.shape_cast %26 : vector<1x1x8x128xf32> to vector<8x128xf32>
    %28 = vector.shape_cast %25 : vector<8x128xf32> to vector<1x1x8x128xf32>
    tpu.vector_store %arg6[%c0_16, %c0_17, %c0_18, %c0_19], %28 {strides = array<i32>} : memref<4x2x8x128xf32, #tpu.memory_space<vmem>>, vector<1x1x8x128xf32>,
    %29 = vector.extract_strided_slice %24 {offsets = [0, 128], sizes = [8, 128], strides = [1, 1]} : vector<8x256xf32> to vector<8x128xf32>
    %c0_20 = arith.constant 0 : index
    %c1 = arith.constant 1 : index
    %c0_21 = arith.constant 0 : index
    %c0_22 = arith.constant 0 : index
    %30 = vector.load %arg6[%c0_20, %c1, %c0_21, %c0_22] : memref<4x2x8x128xf32, #tpu.memory_space<vmem>>, vector<1x1x8x128xf32>
    %31 = vector.shape_cast %30 : vector<1x1x8x128xf32> to vector<8x128xf32>
    %32 = vector.shape_cast %29 : vector<8x128xf32> to vector<1x1x8x128xf32>
    tpu.vector_store %arg6[%c0_20, %c1, %c0_21, %c0_22], %32 {strides = array<i32>} : memref<4x2x8x128xf32, #tpu.memory_space<vmem>>, vector<1x1x8x128xf32>,
    %33 = vector.extract_strided_slice %22 {offsets = [0, 0], sizes = [8, 256], strides = [1, 1]} : vector<16x256xf32> to vector<8x256xf32>
    %34 = arith.addf %33, %3 : vector<8x256xf32>
    %c254_i32 = arith.constant 254 : i32
    %35 = tpu.dynamic_rotate %34 by %c254_i32 dim 1 : vector<8x256xf32>, i32 -> vector<8x256xf32>
    %36 = tpu.concatenate %34, %35 in 0 : vector<8x256xf32>, vector<8x256xf32> -> vector<16x256xf32>
    %37 = arith.truncf %36 : vector<16x256xf32> to vector<16x256xbf16>
    %c1_23 = arith.constant 1 : index
    %c0_24 = arith.constant 0 : index
    %c0_25 = arith.constant 0 : index
    %38 = vector.load %arg2[%c1_23, %c0_24, %c0_25] : memref<4x8x16xbf16, #tpu.memory_space<vmem>>, vector<1x8x16xbf16>
    %39 = vector.shape_cast %38 : vector<1x8x16xbf16> to vector<8x16xbf16>
    %cst_26 = arith.constant dense<0.000000e+00> : vector<8x256xf32>
    %40 = tpu.matmul %39, %37, %cst_26 {dimension_numbers = #tpu.dot_dimension_numbers<[1], [0], [0], [1], [0, 0, 1, 1], [], []>} : vector<8x16xbf16>, vector<16x256xbf16>, vector<8x256xf32> -> vector<8x256xf32>
    %c1_27 = arith.constant 1 : index
    %c0_28 = arith.constant 0 : index
    %c0_29 = arith.constant 0 : index
    %41 = vector.load %arg4[%c1_27, %c0_28, %c0_29] : memref<4x8x1xf32, #tpu.memory_space<vmem>>, vector<1x8x1xf32>
    %42 = vector.shape_cast %41 : vector<1x8x1xf32> to vector<8x1xf32>
    %43 = vector.broadcast %42 : vector<8x1xf32> to vector<8x256xf32>
    %44 = arith.addf %40, %43 : vector<8x256xf32>
    %cst_30 = arith.constant 0.000000e+00 : f32
    %45 = vector.broadcast %cst_30 : f32 to vector<8x256xf32>
    %46 = arith.maximumf %44, %45 : vector<8x256xf32>
    %c1_31 = arith.constant 1 : index
    %c0_32 = arith.constant 0 : index
    %c0_33 = arith.constant 0 : index
    %47 = vector.load %arg3[%c1_31, %c0_32, %c0_33] : memref<4x16x8xbf16, #tpu.memory_space<vmem>>, vector<1x16x8xbf16>
    %48 = vector.shape_cast %47 : vector<1x16x8xbf16> to vector<16x8xbf16>
    %49 = arith.truncf %46 : vector<8x256xf32> to vector<8x256xbf16>
    %cst_34 = arith.constant dense<0.000000e+00> : vector<16x256xf32>
    %50 = tpu.matmul %48, %49, %cst_34 {dimension_numbers = #tpu.dot_dimension_numbers<[1], [0], [0], [1], [0, 0, 1, 1], [], []>} : vector<16x8xbf16>, vector<8x256xbf16>, vector<16x256xf32> -> vector<16x256xf32>
    %c1_35 = arith.constant 1 : index
    %c0_36 = arith.constant 0 : index
    %c0_37 = arith.constant 0 : index
    %51 = vector.load %arg5[%c1_35, %c0_36, %c0_37] : memref<4x16x1xf32, #tpu.memory_space<vmem>>, vector<1x16x1xf32>
    %52 = vector.shape_cast %51 : vector<1x16x1xf32> to vector<16x1xf32>
    %53 = vector.broadcast %52 : vector<16x1xf32> to vector<16x256xf32>
    %54 = arith.addf %50, %53 : vector<16x256xf32>
    %55 = vector.extract_strided_slice %54 {offsets = [8, 0], sizes = [8, 256], strides = [1, 1]} : vector<16x256xf32> to vector<8x256xf32>
    %c251_i32 = arith.constant 251 : i32
    %56 = tpu.dynamic_rotate %55 by %c251_i32 dim 1 : vector<8x256xf32>, i32 -> vector<8x256xf32>
    %57 = vector.extract_strided_slice %56 {offsets = [0, 0], sizes = [8, 128], strides = [1, 1]} : vector<8x256xf32> to vector<8x128xf32>
    %c1_38 = arith.constant 1 : index
    %c0_39 = arith.constant 0 : index
    %c0_40 = arith.constant 0 : index
    %c0_41 = arith.constant 0 : index
    %58 = vector.load %arg6[%c1_38, %c0_39, %c0_40, %c0_41] : memref<4x2x8x128xf32, #tpu.memory_space<vmem>>, vector<1x1x8x128xf32>
    %59 = vector.shape_cast %58 : vector<1x1x8x128xf32> to vector<8x128xf32>
    %60 = vector.shape_cast %57 : vector<8x128xf32> to vector<1x1x8x128xf32>
    tpu.vector_store %arg6[%c1_38, %c0_39, %c0_40, %c0_41], %60 {strides = array<i32>} : memref<4x2x8x128xf32, #tpu.memory_space<vmem>>, vector<1x1x8x128xf32>,
    %61 = vector.extract_strided_slice %56 {offsets = [0, 128], sizes = [8, 128], strides = [1, 1]} : vector<8x256xf32> to vector<8x128xf32>
    %c1_42 = arith.constant 1 : index
    %c1_43 = arith.constant 1 : index
    %c0_44 = arith.constant 0 : index
    %c0_45 = arith.constant 0 : index
    %62 = vector.load %arg6[%c1_42, %c1_43, %c0_44, %c0_45] : memref<4x2x8x128xf32, #tpu.memory_space<vmem>>, vector<1x1x8x128xf32>
    %63 = vector.shape_cast %62 : vector<1x1x8x128xf32> to vector<8x128xf32>
    %64 = vector.shape_cast %61 : vector<8x128xf32> to vector<1x1x8x128xf32>
    tpu.vector_store %arg6[%c1_42, %c1_43, %c0_44, %c0_45], %64 {strides = array<i32>} : memref<4x2x8x128xf32, #tpu.memory_space<vmem>>, vector<1x1x8x128xf32>,
    %65 = vector.extract_strided_slice %54 {offsets = [0, 0], sizes = [8, 256], strides = [1, 1]} : vector<16x256xf32> to vector<8x256xf32>
    %66 = arith.addf %65, %35 : vector<8x256xf32>
    %c255_i32_46 = arith.constant 255 : i32
    %67 = tpu.dynamic_rotate %66 by %c255_i32_46 dim 1 : vector<8x256xf32>, i32 -> vector<8x256xf32>
    %68 = tpu.concatenate %66, %67 in 0 : vector<8x256xf32>, vector<8x256xf32> -> vector<16x256xf32>
    %69 = arith.truncf %68 : vector<16x256xf32> to vector<16x256xbf16>
    %c2 = arith.constant 2 : index
    %c0_47 = arith.constant 0 : index
    %c0_48 = arith.constant 0 : index
    %70 = vector.load %arg2[%c2, %c0_47, %c0_48] : memref<4x8x16xbf16, #tpu.memory_space<vmem>>, vector<1x8x16xbf16>
    %71 = vector.shape_cast %70 : vector<1x8x16xbf16> to vector<8x16xbf16>
    %cst_49 = arith.constant dense<0.000000e+00> : vector<8x256xf32>
    %72 = tpu.matmul %71, %69, %cst_49 {dimension_numbers = #tpu.dot_dimension_numbers<[1], [0], [0], [1], [0, 0, 1, 1], [], []>} : vector<8x16xbf16>, vector<16x256xbf16>, vector<8x256xf32> -> vector<8x256xf32>
    %c2_50 = arith.constant 2 : index
    %c0_51 = arith.constant 0 : index
    %c0_52 = arith.constant 0 : index
    %73 = vector.load %arg4[%c2_50, %c0_51, %c0_52] : memref<4x8x1xf32, #tpu.memory_space<vmem>>, vector<1x8x1xf32>
    %74 = vector.shape_cast %73 : vector<1x8x1xf32> to vector<8x1xf32>
    %75 = vector.broadcast %74 : vector<8x1xf32> to vector<8x256xf32>
    %76 = arith.addf %72, %75 : vector<8x256xf32>
    %cst_53 = arith.constant 0.000000e+00 : f32
    %77 = vector.broadcast %cst_53 : f32 to vector<8x256xf32>
    %78 = arith.maximumf %76, %77 : vector<8x256xf32>
    %c2_54 = arith.constant 2 : index
    %c0_55 = arith.constant 0 : index
    %c0_56 = arith.constant 0 : index
    %79 = vector.load %arg3[%c2_54, %c0_55, %c0_56] : memref<4x16x8xbf16, #tpu.memory_space<vmem>>, vector<1x16x8xbf16>
    %80 = vector.shape_cast %79 : vector<1x16x8xbf16> to vector<16x8xbf16>
    %81 = arith.truncf %78 : vector<8x256xf32> to vector<8x256xbf16>
    %cst_57 = arith.constant dense<0.000000e+00> : vector<16x256xf32>
    %82 = tpu.matmul %80, %81, %cst_57 {dimension_numbers = #tpu.dot_dimension_numbers<[1], [0], [0], [1], [0, 0, 1, 1], [], []>} : vector<16x8xbf16>, vector<8x256xbf16>, vector<16x256xf32> -> vector<16x256xf32>
    %c2_58 = arith.constant 2 : index
    %c0_59 = arith.constant 0 : index
    %c0_60 = arith.constant 0 : index
    %83 = vector.load %arg5[%c2_58, %c0_59, %c0_60] : memref<4x16x1xf32, #tpu.memory_space<vmem>>, vector<1x16x1xf32>
    %84 = vector.shape_cast %83 : vector<1x16x1xf32> to vector<16x1xf32>
    %85 = vector.broadcast %84 : vector<16x1xf32> to vector<16x256xf32>
    %86 = arith.addf %82, %85 : vector<16x256xf32>
    %87 = vector.extract_strided_slice %86 {offsets = [8, 0], sizes = [8, 256], strides = [1, 1]} : vector<16x256xf32> to vector<8x256xf32>
    %c252_i32 = arith.constant 252 : i32
    %88 = tpu.dynamic_rotate %87 by %c252_i32 dim 1 : vector<8x256xf32>, i32 -> vector<8x256xf32>
    %89 = vector.extract_strided_slice %88 {offsets = [0, 0], sizes = [8, 128], strides = [1, 1]} : vector<8x256xf32> to vector<8x128xf32>
    %c2_61 = arith.constant 2 : index
    %c0_62 = arith.constant 0 : index
    %c0_63 = arith.constant 0 : index
    %c0_64 = arith.constant 0 : index
    %90 = vector.load %arg6[%c2_61, %c0_62, %c0_63, %c0_64] : memref<4x2x8x128xf32, #tpu.memory_space<vmem>>, vector<1x1x8x128xf32>
    %91 = vector.shape_cast %90 : vector<1x1x8x128xf32> to vector<8x128xf32>
    %92 = vector.shape_cast %89 : vector<8x128xf32> to vector<1x1x8x128xf32>
    tpu.vector_store %arg6[%c2_61, %c0_62, %c0_63, %c0_64], %92 {strides = array<i32>} : memref<4x2x8x128xf32, #tpu.memory_space<vmem>>, vector<1x1x8x128xf32>,
    %93 = vector.extract_strided_slice %88 {offsets = [0, 128], sizes = [8, 128], strides = [1, 1]} : vector<8x256xf32> to vector<8x128xf32>
    %c2_65 = arith.constant 2 : index
    %c1_66 = arith.constant 1 : index
    %c0_67 = arith.constant 0 : index
    %c0_68 = arith.constant 0 : index
    %94 = vector.load %arg6[%c2_65, %c1_66, %c0_67, %c0_68] : memref<4x2x8x128xf32, #tpu.memory_space<vmem>>, vector<1x1x8x128xf32>
    %95 = vector.shape_cast %94 : vector<1x1x8x128xf32> to vector<8x128xf32>
    %96 = vector.shape_cast %93 : vector<8x128xf32> to vector<1x1x8x128xf32>
    tpu.vector_store %arg6[%c2_65, %c1_66, %c0_67, %c0_68], %96 {strides = array<i32>} : memref<4x2x8x128xf32, #tpu.memory_space<vmem>>, vector<1x1x8x128xf32>,
    %97 = vector.extract_strided_slice %86 {offsets = [0, 0], sizes = [8, 256], strides = [1, 1]} : vector<16x256xf32> to vector<8x256xf32>
    %98 = arith.addf %97, %67 : vector<8x256xf32>
    %c254_i32_69 = arith.constant 254 : i32
    %99 = tpu.dynamic_rotate %98 by %c254_i32_69 dim 1 : vector<8x256xf32>, i32 -> vector<8x256xf32>
    %100 = tpu.concatenate %98, %99 in 0 : vector<8x256xf32>, vector<8x256xf32> -> vector<16x256xf32>
    %101 = arith.truncf %100 : vector<16x256xf32> to vector<16x256xbf16>
    %c3 = arith.constant 3 : index
    %c0_70 = arith.constant 0 : index
    %c0_71 = arith.constant 0 : index
    %102 = vector.load %arg2[%c3, %c0_70, %c0_71] : memref<4x8x16xbf16, #tpu.memory_space<vmem>>, vector<1x8x16xbf16>
    %103 = vector.shape_cast %102 : vector<1x8x16xbf16> to vector<8x16xbf16>
    %cst_72 = arith.constant dense<0.000000e+00> : vector<8x256xf32>
    %104 = tpu.matmul %103, %101, %cst_72 {dimension_numbers = #tpu.dot_dimension_numbers<[1], [0], [0], [1], [0, 0, 1, 1], [], []>} : vector<8x16xbf16>, vector<16x256xbf16>, vector<8x256xf32> -> vector<8x256xf32>
    %c3_73 = arith.constant 3 : index
    %c0_74 = arith.constant 0 : index
    %c0_75 = arith.constant 0 : index
    %105 = vector.load %arg4[%c3_73, %c0_74, %c0_75] : memref<4x8x1xf32, #tpu.memory_space<vmem>>, vector<1x8x1xf32>
    %106 = vector.shape_cast %105 : vector<1x8x1xf32> to vector<8x1xf32>
    %107 = vector.broadcast %106 : vector<8x1xf32> to vector<8x256xf32>
    %108 = arith.addf %104, %107 : vector<8x256xf32>
    %cst_76 = arith.constant 0.000000e+00 : f32
    %109 = vector.broadcast %cst_76 : f32 to vector<8x256xf32>
    %110 = arith.maximumf %108, %109 : vector<8x256xf32>
    %c3_77 = arith.constant 3 : index
    %c0_78 = arith.constant 0 : index
    %c0_79 = arith.constant 0 : index
    %111 = vector.load %arg3[%c3_77, %c0_78, %c0_79] : memref<4x16x8xbf16, #tpu.memory_space<vmem>>, vector<1x16x8xbf16>
    %112 = vector.shape_cast %111 : vector<1x16x8xbf16> to vector<16x8xbf16>
    %113 = arith.truncf %110 : vector<8x256xf32> to vector<8x256xbf16>
    %cst_80 = arith.constant dense<0.000000e+00> : vector<16x256xf32>
    %114 = tpu.matmul %112, %113, %cst_80 {dimension_numbers = #tpu.dot_dimension_numbers<[1], [0], [0], [1], [0, 0, 1, 1], [], []>} : vector<16x8xbf16>, vector<8x256xbf16>, vector<16x256xf32> -> vector<16x256xf32>
    %c3_81 = arith.constant 3 : index
    %c0_82 = arith.constant 0 : index
    %c0_83 = arith.constant 0 : index
    %115 = vector.load %arg5[%c3_81, %c0_82, %c0_83] : memref<4x16x1xf32, #tpu.memory_space<vmem>>, vector<1x16x1xf32>
    %116 = vector.shape_cast %115 : vector<1x16x1xf32> to vector<16x1xf32>
    %117 = vector.broadcast %116 : vector<16x1xf32> to vector<16x256xf32>
    %118 = arith.addf %114, %117 : vector<16x256xf32>
    %119 = vector.extract_strided_slice %118 {offsets = [8, 0], sizes = [8, 256], strides = [1, 1]} : vector<16x256xf32> to vector<8x256xf32>
    %c254_i32_84 = arith.constant 254 : i32
    %120 = tpu.dynamic_rotate %119 by %c254_i32_84 dim 1 : vector<8x256xf32>, i32 -> vector<8x256xf32>
    %121 = vector.extract_strided_slice %120 {offsets = [0, 0], sizes = [8, 128], strides = [1, 1]} : vector<8x256xf32> to vector<8x128xf32>
    %c3_85 = arith.constant 3 : index
    %c0_86 = arith.constant 0 : index
    %c0_87 = arith.constant 0 : index
    %c0_88 = arith.constant 0 : index
    %122 = vector.load %arg6[%c3_85, %c0_86, %c0_87, %c0_88] : memref<4x2x8x128xf32, #tpu.memory_space<vmem>>, vector<1x1x8x128xf32>
    %123 = vector.shape_cast %122 : vector<1x1x8x128xf32> to vector<8x128xf32>
    %124 = vector.shape_cast %121 : vector<8x128xf32> to vector<1x1x8x128xf32>
    tpu.vector_store %arg6[%c3_85, %c0_86, %c0_87, %c0_88], %124 {strides = array<i32>} : memref<4x2x8x128xf32, #tpu.memory_space<vmem>>, vector<1x1x8x128xf32>,
    %125 = vector.extract_strided_slice %120 {offsets = [0, 128], sizes = [8, 128], strides = [1, 1]} : vector<8x256xf32> to vector<8x128xf32>
    %c3_89 = arith.constant 3 : index
    %c1_90 = arith.constant 1 : index
    %c0_91 = arith.constant 0 : index
    %c0_92 = arith.constant 0 : index
    %126 = vector.load %arg6[%c3_89, %c1_90, %c0_91, %c0_92] : memref<4x2x8x128xf32, #tpu.memory_space<vmem>>, vector<1x1x8x128xf32>
    %127 = vector.shape_cast %126 : vector<1x1x8x128xf32> to vector<8x128xf32>
    %128 = vector.shape_cast %125 : vector<8x128xf32> to vector<1x1x8x128xf32>
    tpu.vector_store %arg6[%c3_89, %c1_90, %c0_91, %c0_92], %128 {strides = array<i32>} : memref<4x2x8x128xf32, #tpu.memory_space<vmem>>, vector<1x1x8x128xf32>,
    return
  }
  func.func @transform_0(%arg0: i32) -> (i32, i32, i32) {
    %c0_i32 = arith.constant 0 : i32
    %c0_i32_0 = arith.constant 0 : i32
    %c0_i32_1 = arith.constant 0 : i32
    return %arg0, %c0_i32, %c0_i32_0 : i32, i32, i32
  }
  func.func @transform_1(%arg0: i32) -> (i32, i32, i32) {
    %c0_i32 = arith.constant 0 : i32
    %c0_i32_0 = arith.constant 0 : i32
    %c0_i32_1 = arith.constant 0 : i32
    %c0_i32_2 = arith.constant 0 : i32
    return %c0_i32, %c0_i32_0, %c0_i32_1 : i32, i32, i32
  }
  func.func @transform_2(%arg0: i32) -> (i32, i32, i32) {
    %c0_i32 = arith.constant 0 : i32
    %c0_i32_0 = arith.constant 0 : i32
    %c0_i32_1 = arith.constant 0 : i32
    %c0_i32_2 = arith.constant 0 : i32
    return %c0_i32, %c0_i32_0, %c0_i32_1 : i32, i32, i32
  }
  func.func @transform_3(%arg0: i32) -> (i32, i32, i32) {
    %c0_i32 = arith.constant 0 : i32
    %c0_i32_0 = arith.constant 0 : i32
    %c0_i32_1 = arith.constant 0 : i32
    %c0_i32_2 = arith.constant 0 : i32
    return %c0_i32, %c0_i32_0, %c0_i32_1 : i32, i32, i32
  }
  func.func @transform_4(%arg0: i32) -> (i32, i32, i32) {
    %c0_i32 = arith.constant 0 : i32
    %c0_i32_0 = arith.constant 0 : i32
    %c0_i32_1 = arith.constant 0 : i32
    %c0_i32_2 = arith.constant 0 : i32
    return %c0_i32, %c0_i32_0, %c0_i32_1 : i32, i32, i32
  }
  func.func @transform_5(%arg0: i32) -> (i32, i32, i32, i32) {
    %c0_i32 = arith.constant 0 : i32
    %c0_i32_0 = arith.constant 0 : i32
    %c0_i32_1 = arith.constant 0 : i32
    %c0_i32_2 = arith.constant 0 : i32
    return %c0_i32, %arg0, %c0_i32_0, %c0_i32_1 : i32, i32, i32, i32
  }
}

</mosaic_0001>

<bundles_post_ra>
// kernel: residual_stack_forward.1
= control target key start
LH: loop header
LB: loop body
LE: loop exit
PB: predicated region body
PF: predicated region fallthrough
CT: control target
= control target key end

     0   :  { %v691_v1 = vmov 0   ;;  %s692_s20 = smov 127   ;;  %v28_v7 = vlaneseq  ;;  %vm42_vm1 = vcmask 130048   ;;  %vm114_vm2 = vcmask 1043456   ;;  %s693_s30 = smov 126   ;;  %s884_s0 = inlined_call_operand.vmem [shape: bf16[1,8,256], index: 0, kind: input, shape index: {}]   ;;  %s885_s3 = inlined_call_operand.vmem [shape: f32[4,8,1], index: 3, kind: input, shape index: {}]   ;;  %s886_s1 = inlined_call_operand.vmem [shape: bf16[4,8,16], index: 1, kind: input, shape index: {}]   ;;  %s887_s2 = inlined_call_operand.vmem [shape: bf16[4,16,8], index: 2, kind: input, shape index: {}]   ;;  %s888_s4 = inlined_call_operand.vmem [shape: f32[4,16,1], index: 4, kind: input, shape index: {}]   ;;  %s889_s5 = inlined_call_operand.vmem [shape: f32[4,2,8,128], index: 5, kind: output, shape index: {}]  }
   0x1   :  { %v21_v0 = vld [vmem:[%s884_s0] sm:$0xff]  ;;  %78 = vmatprep.mubr.bf16.mxu0 %v691_v1  ;;  %680 = vset.pattern.permute.xlu0 %v691_v1  ;;  %v634_v6 = vld [vmem:[%s885_s3 + $0x8] sm:$0xff]  ;;  %vm110_vm3 = vcmask 64512   ;;  %v638_v40 = vld [vmem:[%s888_s4 + $0x10] sm:$0xff]  ;;  %s695_s6 = smov 123  }
   0x2   :  { %v22_v2 = vunpack.c.l.bf16 %v21_v0  ;;  %v23_v3 = vunpack.c.h.bf16 %v21_v0  ;;  %153 = vmatprep.mubr.bf16.mxu1 %v691_v1  ;;  %681 = vset.pattern.permute.xlu1 %v691_v1  ;;  %v36_v5 = vld [vmem:[%s885_s3] sm:$0xff]  ;;  %v741_v8 = vand.u32 127, %v28_v7  ;;  %v688_v60 = vld [vmem:[%s887_s2 + $0x8] sm:$0xff]   ;;  %v646_v7 = vld [vmem:[%s885_s3 + $0x10] sm:$0xff] }
   0x3   :  { %v35_v16 = vld [vmem:[%s886_s1] sm:$0xf]  ;;  %v633_v47 = vld [vmem:[%s886_s1 + $0x4] sm:$0xf] }
   0x4   :  { %v675_v4 = vpack.i.bf16 %v23_v3, %v22_v2  ;;  %vm30_vm0 = vcmp.lt.s32.totalorder %v741_v8, 127  ;;  %v93_v17 = vld [vmem:[%s888_s4] sm:$0xff]  ;;  %vm180_vm4 = vcmp.lt.s32.totalorder %v741_v8, 126  ;;  %vm168_vm5 = vcmp.lt.s32.totalorder %v741_v8, 121 }
   0x5   :  { %97 = vperm.xlu1 %681, %v93_v17   ;;  %v687_v30 = vld [vmem:[%s887_s2] sm:$0xff]   ;;  %vm319_vm6 = vcmp.lt.s32.totalorder %v741_v8, 123  ;;  %vm470_vm7 = vcmp.lt.s32.totalorder %v741_v8, 124 }
   0x6   :  { %676 = vrot.lane.b32.xlu0 %v675_v4, %s692_s20 }
   0xa   :  { %39 = vperm.xlu0 %680, %v36_v5  }
   0xe   :  { %191 = vperm.xlu0 %680, %v634_v6  }
  0x78   :  { %v677_v9 = vpop.permute.xlu0 %676 }
  0x79   :  { %v679_v10 = vunpack.i.h.bf16 %v677_v9  ;;  %v678_v11 = vunpack.i.l.bf16 %v677_v9  ;;  %v650_v9 = vld [vmem:[%s888_s4 + $0x20] sm:$0xff] }
  0x7b   :  { %v32_v12 = vsel %vm30_vm0, %v679_v10, %v678_v11  ;;  %v31_v13 = vsel %vm30_vm0, %v678_v11, %v679_v10  ;;  %v658_v10 = vld [vmem:[%s885_s3 + $0x18] sm:$0xff] }
  0x7c   :  { %v34_v14 = vpack.c.bf16 %v32_v12, %v23_v3  ;;  %v33_v15 = vpack.c.bf16 %v31_v13, %v22_v2  ;;  %v639_v11 = vld [vmem:[%s888_s4 + $0x18] sm:$0xff] }
  0x7e   :  { %46 = vmatprep.subr.bf16.mxu0 %v34_v14 }
  0x7f   :  { %47 = vmatpush1.bf16.msra.mxu0 %v33_v15 }
  0x82   :  { %628 = vmatmul.mubr.msk.bf16.vlgmr.msra.gmra.mrb[0].mxu0 %vm42_vm1, %v35_v16 }
  0x83   :  { %229 = vmatprep.mubr.bf16.mxu0 %v691_v1 }
  0x84   :  { %v98_v31 = vpop.permute.xlu1 %97 }
  0x89   :  { %v40_v18 = vpop.permute.xlu0 %39 }
  0x8d   :  { %v192_v48 = vpop.permute.xlu0 %191 }
 0x155   :  { %v80_v19 = vpop.f32.mrb[0].mxu0 }
 0x156   :  { %v81_v20 = vadd.f32 %v80_v19, %v40_v18  ;;  %v82_v21 = vpop.f32.mrb[1].mxu0  ;;  %v645_v19 = vld [vmem:[%s886_s1 + $0x8] sm:$0xf] }
 0x157   :  { %v83_v22 = vadd.f32 %v82_v21, %v40_v18  ;;  %v84_v23 = vpop.f32.mrb[2].mxu0 }
 0x158   :  { %v87_v24 = vmax.f32 %v81_v20, 0.0  ;;  %v85_v25 = vpop.f32.mrb[3].mxu0 }
 0x159   :  { %v88_v26 = vmax.f32 %v83_v22, 0.0 }
 0x15a   :  { %v91_v27 = vpack.c.bf16 %v87_v24, %v87_v24 }
 0x15b   :  { %v92_v28 = vpack.c.bf16 %v88_v26, %v88_v26 }
 0x15c   :  { %v116_v29 = vsel %vm114_vm2, %v91_v27, 0 }
 0x15d   :  { %630 = vmatprep.subr.msk.bf16.mxu1 %vm114_vm2, %v92_v28 }
 0x15e   :  { %122 = vmatpush1.bf16.msra.mxu1 %v116_v29 }
 0x161   :  { %631 = vmatmul.mubr.msk.bf16.vlgmr.msra.gmra.mrb[0].mxu1 %vm110_vm3, %v687_v30 }
 0x162   :  { %304 = vmatprep.mubr.bf16.mxu1 %v691_v1 }
 0x234   :  { %v155_v32 = vpop.f32.mrb[0].mxu1 }
 0x235   :  { %v156_v33 = vadd.f32 %v155_v32, %v98_v31  ;;  %v157_v34 = vpop.f32.mrb[1].mxu1  ;;  %v689_v32 = vld [vmem:[%s887_s2 + $0x10] sm:$0xff]  }
 0x236   :  { %v763_v35 = vpop.f32.mrb[2].mxu1  ;;  %v158_v37 = vadd.f32 %v157_v34, %v98_v31 }
 0x237   :  { %v174_v36 = vadd.f32 %v156_v33, %v31_v13  ;;  %v765_v38 = vpop.f32.mrb[3].mxu1 }
 0x238   :  { %v175_v39 = vadd.f32 %v158_v37, %v32_v12  ;;  %v663_v12 = vld [vmem:[%s888_s4 + $0x38] sm:$0xff] }
 0x239   :  { %176 = vrot.lane.b32.xlu1 %v174_v36, %s693_s30 }
 0x23d   :  { %178 = vrot.lane.b32.xlu1 %v175_v39, %s693_s30 }
 0x241   :  { %250 = vperm.xlu1 %681, %v638_v40  }
 0x2ab   :  { %v177_v41 = vpop.permute.xlu1 %176 }
 0x2af   :  { %v179_v42 = vpop.permute.xlu1 %178 }
 0x2b0   :  { %v181_v43 = vsel %vm180_vm4, %v177_v41, %v179_v42  ;;  %v182_v44 = vsel %vm180_vm4, %v179_v42, %v177_v41 }
 0x2b1   :  { %v183_v45 = vpack.c.bf16 %v181_v43, %v174_v36  ;;  %v184_v46 = vpack.c.bf16 %v182_v44, %v175_v39 }
 0x2b3   :  { %197 = vmatprep.subr.bf16.mxu0 %v184_v46 }
 0x2b4   :  { %198 = vmatpush1.bf16.msra.mxu0 %v183_v45  ;;  %v94_v45 = vld [vmem:[%s888_s4 + $0x8] sm:$0xff] }
 0x2b7   :  { %635 = vmatmul.mubr.msk.bf16.vlgmr.msra.gmra.mrb[4].mxu0 %vm42_vm1, %v633_v47 }
 0x2b8   :  { %380 = vmatprep.mubr.bf16.mxu0 %v691_v1 }
 0x2c0   :  { %v251_v61 = vpop.permute.xlu1 %250 }
 0x38a   :  { %v231_v49 = vpop.f32.mrb[4].mxu0 }
 0x38b   :  { %v232_v50 = vadd.f32 %v231_v49, %v192_v48  ;;  %v233_v51 = vpop.f32.mrb[5].mxu0 }
 0x38c   :  { %v234_v52 = vadd.f32 %v233_v51, %v192_v48  ;;  %v235_v53 = vpop.f32.mrb[6].mxu0 }
 0x38d   :  { %v238_v54 = vmax.f32 %v232_v50, 0.0  ;;  %v236_v55 = vpop.f32.mrb[7].mxu0  ;;  %v657_v53 = vld [vmem:[%s886_s1 + $0xc] sm:$0xf]  ;;  %s696_s1 = smov 124  }
 0x38e   :  { %v239_v56 = vmax.f32 %v234_v52, 0.0 }
 0x38f   :  { %v243_v57 = vpack.c.bf16 %v238_v54, %v238_v54 }
 0x390   :  { %v244_v58 = vpack.c.bf16 %v239_v56, %v239_v56 }
 0x391   :  { %v267_v59 = vsel %vm114_vm2, %v243_v57, 0 }
 0x392   :  { %641 = vmatprep.subr.msk.bf16.mxu1 %vm114_vm2, %v244_v58 }
 0x393   :  { %273 = vmatpush1.bf16.msra.mxu1 %v267_v59 }
 0x396   :  { %642 = vmatmul.mubr.msk.bf16.vlgmr.msra.gmra.mrb[4].mxu1 %vm110_vm3, %v688_v60 }
 0x397   :  { %455 = vmatprep.mubr.bf16.mxu1 %v691_v1 }
 0x469   :  { %v306_v62 = vpop.f32.mrb[4].mxu1 }
 0x46a   :  { %v307_v63 = vadd.f32 %v306_v62, %v251_v61  ;;  %v308_v0 = vpop.f32.mrb[5].mxu1 }
 0x46b   :  { %v309_v2 = vadd.f32 %v308_v0, %v251_v61  ;;  %v789_v3 = vpop.f32.mrb[6].mxu1 }
 0x46c   :  { %v326_v4 = vadd.f32 %v307_v63, %v181_v43  ;;  %v791_v5 = vpop.f32.mrb[7].mxu1 }
 0x46d   :  { %v327_v6 = vadd.f32 %v309_v2, %v182_v44 }
 0x46e   :  { %328 = vrot.lane.b32.xlu0 %v326_v4, %s692_s20 }
 0x46f   :  { %330 = vrot.lane.b32.xlu1 %v327_v6, %s692_s20 }
 0x472   :  { %342 = vperm.xlu0 %680, %v646_v7  }
 0x473   :  { %401 = vperm.xlu1 %681, %v650_v9  }
 0x477   :  { %493 = vperm.xlu1 %681, %v658_v10  }
 0x47b   :  { %255 = vperm.xlu1 %681, %v639_v11  }
 0x47f   :  { %556 = vperm.xlu1 %681, %v663_v12  }
 0x4e0   :  { %v329_v13 = vpop.permute.xlu0 %328 }
 0x4e1   :  { %v331_v14 = vpop.permute.xlu1 %330 }
 0x4e2   :  { %v332_v15 = vsel %vm30_vm0, %v329_v13, %v331_v14  ;;  %v333_v16 = vsel %vm30_vm0, %v331_v14, %v329_v13 }
 0x4e3   :  { %v334_v17 = vpack.c.bf16 %v332_v15, %v326_v4  ;;  %v335_v18 = vpack.c.bf16 %v333_v16, %v327_v6 }
 0x4e5   :  { %348 = vmatprep.subr.bf16.mxu0 %v335_v18 }
 0x4e6   :  { %349 = vmatpush1.bf16.msra.mxu0 %v334_v17 }
 0x4e9   :  { %647 = vmatmul.mubr.msk.bf16.vlgmr.msra.gmra.mrb[8].mxu0 %vm42_vm1, %v645_v19 }
 0x4ea   :  { %531 = vmatprep.mubr.bf16.mxu0 %v691_v1 }
 0x4f1   :  { %v343_v20 = vpop.permute.xlu0 %342 }
 0x4f2   :  { %v402_v33 = vpop.permute.xlu1 %401 }
 0x4f6   :  { %v494_v54 = vpop.permute.xlu1 %493 }
 0x4fa   :  { %v256_v58 = vpop.permute.xlu1 %255 }
 0x4fb   :  { %v311_v59 = vadd.f32 %v789_v3, %v256_v58  ;;  %v313_v60 = vadd.f32 %v791_v5, %v256_v58 }
 0x5bc   :  { %v382_v21 = vpop.f32.mrb[8].mxu0 }
 0x5bd   :  { %v383_v22 = vadd.f32 %v382_v21, %v343_v20  ;;  %v384_v23 = vpop.f32.mrb[9].mxu0 }
 0x5be   :  { %v385_v24 = vadd.f32 %v384_v23, %v343_v20  ;;  %v386_v25 = vpop.f32.mrb[10].mxu0 }
 0x5bf   :  { %v389_v26 = vmax.f32 %v383_v22, 0.0  ;;  %v387_v27 = vpop.f32.mrb[11].mxu0 }
 0x5c0   :  { %v390_v28 = vmax.f32 %v385_v24, 0.0  ;;  %v690_v24 = vld [vmem:[%s887_s2 + $0x18] sm:$0xff]  }
 0x5c1   :  { %v394_v29 = vpack.c.bf16 %v389_v26, %v389_v26 }
 0x5c2   :  { %v395_v30 = vpack.c.bf16 %v390_v28, %v390_v28 }
 0x5c3   :  { %v418_v31 = vsel %vm114_vm2, %v394_v29, 0 }
 0x5c4   :  { %653 = vmatprep.subr.msk.bf16.mxu1 %vm114_vm2, %v395_v30 }
 0x5c5   :  { %424 = vmatpush1.bf16.msra.mxu1 %v418_v31 }
 0x5c8   :  { %654 = vmatmul.mubr.msk.bf16.vlgmr.msra.gmra.mrb[8].mxu1 %vm110_vm3, %v689_v32 }
 0x5c9   :  { %605 = vmatprep.mubr.bf16.mxu1 %v691_v1  ;;  %v651_v1 = vld [vmem:[%s888_s4 + $0x28] sm:$0xff]  ;;  %s694_s4 = smov 121  }
 0x69b   :  { %v457_v34 = vpop.f32.mrb[8].mxu1 }
 0x69c   :  { %v458_v36 = vadd.f32 %v457_v34, %v402_v33  ;;  %v459_v37 = vpop.f32.mrb[9].mxu1 }
 0x69d   :  { %v460_v39 = vadd.f32 %v459_v37, %v402_v33  ;;  %v461_v40 = vpop.f32.mrb[10].mxu1 }
 0x69e   :  { %v477_v41 = vadd.f32 %v458_v36, %v332_v15  ;;  %v463_v42 = vpop.f32.mrb[11].mxu1 }
 0x69f   :  { %v478_v43 = vadd.f32 %v460_v39, %v333_v16 }
 0x6a1   :  { %v682_v44 = vpack.i.bf16 %v478_v43, %v477_v41 }
 0x6a3   :  { %683 = vrot.lane.b32.xlu0 %v682_v44, %s693_s30 }
 0x6a7   :  { %102 = vperm.xlu0 %680, %v94_v45  }
 0x6ab   :  { %406 = vperm.xlu0 %680, %v651_v1  }
 0x715   :  { %v684_v46 = vpop.permute.xlu0 %683 }
 0x716   :  { %v686_v47 = vunpack.i.h.bf16 %v684_v46  ;;  %v685_v48 = vunpack.i.l.bf16 %v684_v46 }
 0x718   :  { %v483_v49 = vsel %vm180_vm4, %v685_v48, %v686_v47  ;;  %v484_v50 = vsel %vm180_vm4, %v686_v47, %v685_v48 }
 0x719   :  { %v485_v51 = vpack.c.bf16 %v483_v49, %v477_v41  ;;  %v486_v52 = vpack.c.bf16 %v484_v50, %v478_v43 }
 0x71b   :  { %499 = vmatprep.subr.bf16.mxu0 %v486_v52 }
 0x71c   :  { %500 = vmatpush1.bf16.msra.mxu0 %v485_v51 }
 0x71f   :  { %659 = vmatmul.mubr.msk.bf16.vlgmr.msra.gmra.mrb[12].mxu0 %vm42_vm1, %v657_v53 }
 0x726   :  { %v103_v55 = vpop.permute.xlu0 %102 }
 0x727   :  { %v160_v56 = vadd.f32 %v763_v35, %v103_v55  ;;  %v162_v57 = vadd.f32 %v765_v38, %v103_v55  ;;  %v557_v35 = vpop.permute.xlu1 %556 }
 0x729   :  { %166 = vrot.lane.b32.xlu1 %v162_v57, %s694_s4  ;;  %164 = vrot.lane.b32.xlu0 %v160_v56, %s694_s4 }
 0x72a   :  { %v407_v61 = vpop.permute.xlu0 %406 }
 0x72b   :  { %v462_v62 = vadd.f32 %v461_v40, %v407_v61  ;;  %v464_v63 = vadd.f32 %v463_v42, %v407_v61 }
 0x72d   :  { %317 = vrot.lane.b32.xlu1 %v313_v60, %s695_s6  ;;  %315 = vrot.lane.b32.xlu0 %v311_v59, %s695_s6 }
 0x731   :  { %468 = vrot.lane.b32.xlu1 %v464_v63, %s696_s1  ;;  %466 = vrot.lane.b32.xlu0 %v462_v62, %s696_s1 }
 0x79b   :  { %v167_v38 = vpop.permute.xlu1 %166  ;;  %v165_v0 = vpop.permute.xlu0 %164 }
 0x79c   :  { %v169_v2 = vsel %vm168_vm5, %v165_v0, %v167_v38  ;;  %v170_v4 = vsel %vm168_vm5, %v167_v38, %v165_v0 }
 0x79d   :  { %171 = vst [vmem:[%s889_s5] sm:$0xff] %v169_v2  ;;  %632 = vst [vmem:[%s889_s5 + $0x8] sm:$0xff] %v170_v4 }
 0x79f   :  { %v318_v3 = vpop.permute.xlu1 %317  ;;  %v316_v5 = vpop.permute.xlu0 %315 }
 0x7a0   :  { %v320_v6 = vsel %vm319_vm6, %v316_v5, %v318_v3  ;;  %v321_v7 = vsel %vm319_vm6, %v318_v3, %v316_v5 }
 0x7a1   :  { %643 = vst [vmem:[%s889_s5 + $0x10] sm:$0xff] %v320_v6  ;;  %644 = vst [vmem:[%s889_s5 + $0x18] sm:$0xff] %v321_v7 }
 0x7a3   :  { %v469_v9 = vpop.permute.xlu1 %468  ;;  %v467_v10 = vpop.permute.xlu0 %466 }
 0x7a4   :  { %v471_v11 = vsel %vm470_vm7, %v467_v10, %v469_v9  ;;  %v472_v12 = vsel %vm470_vm7, %v469_v9, %v467_v10 }
 0x7a5   :  { %655 = vst [vmem:[%s889_s5 + $0x20] sm:$0xff] %v471_v11  ;;  %656 = vst [vmem:[%s889_s5 + $0x28] sm:$0xff] %v472_v12 }
 0x7f2   :  { %v533_v13 = vpop.f32.mrb[12].mxu0 }
 0x7f3   :  { %v534_v14 = vadd.f32 %v533_v13, %v494_v54  ;;  %v535_v15 = vpop.f32.mrb[13].mxu0 }
 0x7f4   :  { %v536_v16 = vadd.f32 %v535_v15, %v494_v54  ;;  %v537_v17 = vpop.f32.mrb[14].mxu0 }
 0x7f5   :  { %v540_v18 = vmax.f32 %v534_v14, 0.0  ;;  %v538_v19 = vpop.f32.mrb[15].mxu0 }
 0x7f6   :  { %v541_v20 = vmax.f32 %v536_v16, 0.0 }
 0x7f7   :  { %v545_v21 = vpack.c.bf16 %v540_v18, %v540_v18 }
 0x7f8   :  { %v546_v22 = vpack.c.bf16 %v541_v20, %v541_v20 }
 0x7f9   :  { %v568_v23 = vsel %vm114_vm2, %v545_v21, 0 }
 0x7fa   :  { %665 = vmatprep.subr.msk.bf16.mxu1 %vm114_vm2, %v546_v22 }
 0x7fb   :  { %574 = vmatpush1.bf16.msra.mxu1 %v568_v23 }
 0x7fe   :  { %666 = vmatmul.mubr.msk.bf16.vlgmr.msra.gmra.mrb[12].mxu1 %vm110_vm3, %v690_v24 }
 0x8d1   :  { %v607_v25 = vpop.f32.mrb[12].mxu1 }
 0x8d2   :  { %v608_v26 = vpop.f32.mrb[13].mxu1 }
 0x8d3   :  { %v609_v27 = vpop.f32.mrb[14].mxu1 }
 0x8d4   :  { %v610_v28 = vadd.f32 %v609_v27, %v557_v35  ;;  %v611_v29 = vpop.f32.mrb[15].mxu1 }
 0x8d5   :  { %v612_v30 = vadd.f32 %v611_v29, %v557_v35 }
 0x8d6   :  { %614 = vrot.lane.b32.xlu0 %v610_v28, %s693_s30 }
 0x8d7   :  { %616 = vrot.lane.b32.xlu1 %v612_v30, %s693_s30 }
 0x948   :  { %v615_v31 = vpop.permute.xlu0 %614 }
 0x949   :  { %v617_v32 = vpop.permute.xlu1 %616 }
 0x94a   :  { %v618_v33 = vsel %vm180_vm4, %v615_v31, %v617_v32  ;;  %v619_v34 = vsel %vm180_vm4, %v617_v32, %v615_v31 }
 0x94b   :  { %667 = vst [vmem:[%s889_s5 + $0x30] sm:$0xff] %v618_v33  ;;  %668 = vst [vmem:[%s889_s5 + $0x38] sm:$0xff] %v619_v34 }

</bundles_post_ra>
